<compile_context>
chip_gen: v7x
topology: tpu7x:2x2x1
jax: 0.10.0
libtpu: 0.0.40
codegen_flags: <defaults>
</compile_context>

<pallas_src>
import math

import jax
import jax.numpy as jnp
from jax.experimental import pallas as pl
from jax.experimental.pallas import tpu as pltpu


def _round_up(x, m):
    return -(-x // m) * m


def _vmem_capacity_bytes():
    """Physical VMEM per core; conservative (v7x, 64 MiB) fallback if unknown."""
    try:
        return int(pltpu.get_tpu_info().vmem_capacity_bytes)
    except Exception:
        return 64 * 1024 * 1024


def prepare_embedding_table(emb_table, pad_idx):
    """Run ONCE (outside the per-step forward): bf16 copy of the embedding
    table with the padding row zeroed (matches nn.Embedding(padding_idx))."""
    table = emb_table.astype(jnp.bfloat16)
    if pad_idx is not None:
        table = table.at[pad_idx].set(0)
    return table


# ---------------------------------------------------------------------------
# Kernel 1: streaming sum (mean-pool numerator) over the sequence axis.
# ---------------------------------------------------------------------------
def _pool_kernel(x_ref, o_ref):
    """Grid step (i = batch tile, s = sequence tile).

    x_ref: (ts, tb*E) bf16 lane-dense slab of gathered embeddings (natural
           (S, B, E) layout collapsed to (S, B*E) -- no transpose anywhere).
    o_ref: (1, tb*E)  f32 pooled-sum accumulator; the output block index does
           not depend on s, so it stays resident in VMEM across the sweep.

    The reduction over the ts rows is an MXU matmul with a ones vector
    (bf16 in, f32 accumulate): the MXU is idle otherwise and consumes data far
    faster than HBM supplies it, so the VPU stays free on all generations.
    """
    @pl.when(pl.program_id(1) == 0)
    def _():
        o_ref[...] = jnp.zeros_like(o_ref)

    ones = jnp.ones((1, x_ref.shape[0]), dtype=x_ref.dtype)
    o_ref[...] += jnp.dot(ones, x_ref[...], preferred_element_type=jnp.float32)


# ---------------------------------------------------------------------------
# Kernel 2: the (tiny) fully-connected head on the pooled sums.
# ---------------------------------------------------------------------------
def _fc_kernel(p_ref, w_ref, b_ref, o_ref):
    """p_ref: (tb, E) f32 pooled sums; w_ref: (E, O_pad) f32 weight already
    scaled by 1/S (mean folded in); b_ref: (1, O_pad); o_ref: (tb, O_pad)."""
    o_ref[...] = (
        jnp.dot(p_ref[...], w_ref[...], preferred_element_type=jnp.float32)
        + b_ref[...]
    )


def fasttext_forward(text, emb_table_bf16, fc_weight, fc_bias, *, pad_idx=0):
    """text: (S, B) int32; emb_table_bf16: (V, E) bf16 (prepare_embedding_table);
    fc_weight: (O, E); fc_bias: (O,).  Returns (B, O) f32 logits matching
        fc(avg_pool2d(embedding(text).permute(1,0,2), (S,1)).squeeze(1)).
    """
    S, B = text.shape
    V, E = emb_table_bf16.shape
    O = fc_weight.shape[0]

    # ---- per-generation VMEM budget ----------------------------------------
    vmem_cap = _vmem_capacity_bytes()
    big_vmem = vmem_cap >= 96 * 1024 * 1024        # v5e/v6e: 128 MiB, v7x: 64 MiB
    per_buf_bytes = (8 if big_vmem else 4) * 1024 * 1024
    vmem_limit = (64 if big_vmem else 40) * 1024 * 1024

    # ---- batch tile: lane-dense (tb*E % 128 == 0), aim for >= 2 tiles -------
    tb_align = max(8, 128 // math.gcd(E, 128))     # tb*E % 128 == 0, tb % 8 == 0
    tb = min(256, _round_up(max(1, -(-B // 2)), tb_align))
    # keep one 8-row slab of a streamed tile within the per-buffer budget
    max_tb = max(tb_align, (per_buf_bytes // (2 * 8 * E)) // tb_align * tb_align)
    tb = max(tb_align, min(tb, max_tb))
    pad_B = _round_up(B, tb)
    tbe = tb * E

    # ---- sequence tile: biggest multiple of 8 fitting the per-buffer budget -
    ts_cap = max(8, (per_buf_bytes // (tbe * 2)) // 8 * 8)
    ts = min(ts_cap, _round_up(S, 8))
    pad_S = _round_up(S, ts)

    # ---- pad token ids (cheap int32), NOT the gathered bf16 tensor ----------
    # Padded sequence rows use pad_idx whose embedding row is zero, so the
    # sum is unchanged; padded batch columns are sliced off at the end.
    if (pad_S, pad_B) != (S, B):
        text = jnp.pad(text, ((0, pad_S - S), (0, pad_B - B)),
                       constant_values=pad_idx)

    # ---- embedding gather (XLA) in natural (S, B, E) layout ------------------
    # TODO(synk): fuse this gather into the kernel (scalar-prefetched ids +
    # manual row DMAs from an HBM-resident table) to remove the HBM
    # write+read of this tensor; with E=32 per-row DMAs are too small to win.
    x = emb_table_bf16[text]                       # (pad_S, pad_B, E) bf16
    x2d = x.reshape(pad_S, pad_B * E)              # free contiguous collapse

    n_batch_tiles = pad_B // tb
    grid = (n_batch_tiles, pad_S // ts)            # (parallel, reduction)

    pooled_sum = pl.pallas_call(
        _pool_kernel,
        out_shape=jax.ShapeDtypeStruct((1, pad_B * E), jnp.float32),
        grid_spec=pltpu.PrefetchScalarGridSpec(
            num_scalar_prefetch=0,
            grid=grid,
            in_specs=[pl.BlockSpec((ts, tbe), lambda i, s: (s, i))],
            out_specs=pl.BlockSpec((1, tbe), lambda i, s: (0, i)),
        ),
        compiler_params=pltpu.CompilerParams(
            dimension_semantics=("parallel", "arbitrary"),
            vmem_limit_bytes=vmem_limit,
        ),
    )(x2d)

    pooled_sum = pooled_sum.reshape(pad_B, E)      # free contiguous reshape

    # ---- tiny FC head: lane-dense O padding, 1/S of the mean folded into W --
    # (Weight kept f32: the dot runs once per batch tile, so the multi-pass
    #  f32 MXU cost is irrelevant and numerical fidelity is preserved.)
    O_pad = _round_up(max(O, 128), 128)
    w_t = fc_weight.T.astype(jnp.float32) / jnp.float32(S)     # (E, O)
    w_t = jnp.pad(w_t, ((0, 0), (0, O_pad - O)))               # (E, O_pad)
    b2 = jnp.pad(fc_bias.astype(jnp.float32), (0, O_pad - O)).reshape(1, O_pad)

    out_padded = pl.pallas_call(
        _fc_kernel,
        out_shape=jax.ShapeDtypeStruct((pad_B, O_pad), jnp.float32),
        grid_spec=pltpu.PrefetchScalarGridSpec(
            num_scalar_prefetch=0,
            grid=(n_batch_tiles,),
            in_specs=[
                pl.BlockSpec((tb, E), lambda i: (i, 0)),        # pooled sums
                pl.BlockSpec((E, O_pad), lambda i: (0, 0)),     # resident W/S
                pl.BlockSpec((1, O_pad), lambda i: (0, 0)),     # resident bias
            ],
            out_specs=pl.BlockSpec((tb, O_pad), lambda i: (i, 0)),
        ),
        compiler_params=pltpu.CompilerParams(
            dimension_semantics=("parallel",),
        ),
    )(pooled_sum, w_t, b2)

    return out_padded[:B, :O]


if __name__ == "__main__":
    # Small, deterministic problem consistent with the module's forward.
    VOCAB_SIZE = 50
    EMBEDDING_DIM = 32
    OUTPUT_DIM = 4
    PAD_IDX = 0
    SEQ_LEN = 8
    BATCH = 2

    key = jax.random.PRNGKey(0)
    k_emb, k_w, k_b, k_tok = jax.random.split(key, 4)

    # nn.Embedding(vocab, emb, padding_idx=pad_idx): pad row is zeroed.
    emb_table = jax.random.normal(k_emb, (VOCAB_SIZE, EMBEDDING_DIM), jnp.float32)
    emb_table = emb_table.at[PAD_IDX].set(0.0)

    # nn.Linear(emb_dim, output_dim): weight (out, in), bias (out,)
    fc_weight = 0.1 * jax.random.normal(k_w, (OUTPUT_DIM, EMBEDDING_DIM), jnp.float32)
    fc_bias = 0.1 * jax.random.normal(k_b, (OUTPUT_DIM,), jnp.float32)

    # text: (seq_len, batch) int tokens (torchtext convention), with pads.
    text = jax.random.randint(k_tok, (SEQ_LEN, BATCH), 0, VOCAB_SIZE, jnp.int32)
    text = text.at[-2:, :].set(PAD_IDX)

    # One-time preparation (hoisted out of the per-step forward).
    emb_bf16 = prepare_embedding_table(emb_table, PAD_IDX)

    forward = jax.jit(fasttext_forward, static_argnames=("pad_idx",))
    out = forward(text, emb_bf16, fc_weight, fc_bias, pad_idx=PAD_IDX)
    out = jax.block_until_ready(out)
    assert out.shape == (BATCH, OUTPUT_DIM)

    # Reference 1: exact PyTorch f32 semantics (loose tol: embeddings stream bf16).
    ref_emb = emb_table[text]                                            # (S, B, E)
    ref_pooled = jnp.mean(jnp.transpose(ref_emb, (1, 0, 2)), axis=1)     # (B, E)
    ref_out = ref_pooled @ fc_weight.T + fc_bias                         # (B, O)
    assert jnp.allclose(out, ref_out, atol=2e-2, rtol=2e-2)

    # Reference 2: bf16-consistent reference (tight tol).
    ref_emb_bf = emb_table.astype(jnp.bfloat16).astype(jnp.float32)[text]
    ref_out_bf = jnp.mean(ref_emb_bf, axis=0) @ fc_weight.T + fc_bias
    assert jnp.allclose(out, ref_out_bf, atol=1e-4, rtol=1e-4)

    print("KERNEL_OK")
</pallas_src>

<mosaic_0001>
module attributes {stable_mosaic.version = 11 : i64} {
  func.func @_pool_kernel(%arg0: i32, %arg1: i32, %arg2: memref<8x256xbf16, #tpu.memory_space<vmem>>, %arg3: memref<1x256xf32, #tpu.memory_space<vmem>>) attributes {dimension_semantics = [#tpu.dimension_semantics<parallel>, #tpu.dimension_semantics<arbitrary>], iteration_bounds = array<i64: 1, 1>, scalar_prefetch = 0 : i64, scratch_operands = 0 : i64, tpu.core_type = #tpu.core_type<tc>, window_params = [{transform_indices = @transform_0, window_bounds = array<i64: 8, 256>}, {transform_indices = @transform_1, window_bounds = array<i64: 1, 256>}]} {
    %c0_i32 = arith.constant 0 : i32
    %0 = arith.cmpi eq, %arg1, %c0_i32 : i32
    %1 = arith.extui %0 : i1 to i32
    %c0_i32_0 = arith.constant 0 : i32
    %2 = arith.cmpi ne, %1, %c0_i32_0 : i32
    scf.if %2 {
      %cst_7 = arith.constant 0.000000e+00 : f32
      %9 = vector.broadcast %cst_7 : f32 to vector<1x256xf32>
      %c0_8 = arith.constant 0 : index
      %c0_9 = arith.constant 0 : index
      %10 = vector.load %arg3[%c0_8, %c0_9] : memref<1x256xf32, #tpu.memory_space<vmem>>, vector<1x256xf32>
      tpu.vector_store %arg3[%c0_8, %c0_9], %9 {strides = array<i32>} : memref<1x256xf32, #tpu.memory_space<vmem>>, vector<1x256xf32>,
    } else {
    }
    %cst = arith.constant 1.000000e+00 : bf16
    %3 = vector.broadcast %cst : bf16 to vector<1x8xbf16>
    %c0 = arith.constant 0 : index
    %c0_1 = arith.constant 0 : index
    %4 = vector.load %arg3[%c0, %c0_1] : memref<1x256xf32, #tpu.memory_space<vmem>>, vector<1x256xf32>
    %c0_2 = arith.constant 0 : index
    %c0_3 = arith.constant 0 : index
    %5 = vector.load %arg2[%c0_2, %c0_3] : memref<8x256xbf16, #tpu.memory_space<vmem>>, vector<8x256xbf16>
    %cst_4 = arith.constant dense<0.000000e+00> : vector<1x256xf32>
    %6 = tpu.matmul %3, %5, %cst_4 {dimension_numbers = #tpu.dot_dimension_numbers<[1], [0], [0], [1], [0, 0, 1, 1], [], []>} : vector<1x8xbf16>, vector<8x256xbf16>, vector<1x256xf32> -> vector<1x256xf32>
    %7 = arith.addf %4, %6 : vector<1x256xf32>
    %c0_5 = arith.constant 0 : index
    %c0_6 = arith.constant 0 : index
    %8 = vector.load %arg3[%c0_5, %c0_6] : memref<1x256xf32, #tpu.memory_space<vmem>>, vector<1x256xf32>
    tpu.vector_store %arg3[%c0_5, %c0_6], %7 {strides = array<i32>} : memref<1x256xf32, #tpu.memory_space<vmem>>, vector<1x256xf32>,
    return
  }
  func.func @transform_0(%arg0: i32, %arg1: i32) -> (i32, i32) {
    %c0_i32 = arith.constant 0 : i32
    return %arg1, %arg0 : i32, i32
  }
  func.func @transform_1(%arg0: i32, %arg1: i32) -> (i32, i32) {
    %c0_i32 = arith.constant 0 : i32
    %c0_i32_0 = arith.constant 0 : i32
    return %c0_i32, %arg0 : i32, i32
  }
}

module attributes {stable_mosaic.version = 11 : i64} {
  func.func @_fc_kernel(%arg0: i32, %arg1: memref<8x32xf32, #tpu.memory_space<vmem>>, %arg2: memref<32x128xf32, #tpu.memory_space<vmem>>, %arg3: memref<1x128xf32, #tpu.memory_space<vmem>>, %arg4: memref<8x128xf32, #tpu.memory_space<vmem>>) attributes {dimension_semantics = [#tpu.dimension_semantics<parallel>], iteration_bounds = array<i64: 1>, scalar_prefetch = 0 : i64, scratch_operands = 0 : i64, tpu.core_type = #tpu.core_type<tc>, window_params = [{transform_indices = @transform_0, window_bounds = array<i64: 8, 32>}, {pipeline_mode = #tpu.pipeline_mode<synchronous>, transform_indices = @transform_1, window_bounds = array<i64: 32, 128>}, {pipeline_mode = #tpu.pipeline_mode<synchronous>, transform_indices = @transform_2, window_bounds = array<i64: 1, 128>}, {transform_indices = @transform_3, window_bounds = array<i64: 8, 128>}]} {
    %c0 = arith.constant 0 : index
    %c0_0 = arith.constant 0 : index
    %0 = vector.load %arg1[%c0, %c0_0] : memref<8x32xf32, #tpu.memory_space<vmem>>, vector<8x32xf32>
    %c0_1 = arith.constant 0 : index
    %c0_2 = arith.constant 0 : index
    %1 = vector.load %arg2[%c0_1, %c0_2] : memref<32x128xf32, #tpu.memory_space<vmem>>, vector<32x128xf32>
    %cst = arith.constant dense<0.000000e+00> : vector<8x128xf32>
    %2 = tpu.matmul %0, %1, %cst {dimension_numbers = #tpu.dot_dimension_numbers<[1], [0], [0], [1], [0, 0, 1, 1], [], []>} : vector<8x32xf32>, vector<32x128xf32>, vector<8x128xf32> -> vector<8x128xf32>
    %c0_3 = arith.constant 0 : index
    %c0_4 = arith.constant 0 : index
    %3 = vector.load %arg3[%c0_3, %c0_4] : memref<1x128xf32, #tpu.memory_space<vmem>>, vector<1x128xf32>
    %4 = vector.broadcast %3 : vector<1x128xf32> to vector<8x128xf32>
    %5 = arith.addf %2, %4 : vector<8x128xf32>
    %c0_5 = arith.constant 0 : index
    %c0_6 = arith.constant 0 : index
    %6 = vector.load %arg4[%c0_5, %c0_6] : memref<8x128xf32, #tpu.memory_space<vmem>>, vector<8x128xf32>
    tpu.vector_store %arg4[%c0_5, %c0_6], %5 {strides = array<i32>} : memref<8x128xf32, #tpu.memory_space<vmem>>, vector<8x128xf32>,
    return
  }
  func.func @transform_0(%arg0: i32) -> (i32, i32) {
    %c0_i32 = arith.constant 0 : i32
    %c0_i32_0 = arith.constant 0 : i32
    return %arg0, %c0_i32 : i32, i32
  }
  func.func @transform_1(%arg0: i32) -> (i32, i32) {
    %c0_i32 = arith.constant 0 : i32
    %c0_i32_0 = arith.constant 0 : i32
    %c0_i32_1 = arith.constant 0 : i32
    return %c0_i32, %c0_i32_0 : i32, i32
  }
  func.func @transform_2(%arg0: i32) -> (i32, i32) {
    %c0_i32 = arith.constant 0 : i32
    %c0_i32_0 = arith.constant 0 : i32
    %c0_i32_1 = arith.constant 0 : i32
    return %c0_i32, %c0_i32_0 : i32, i32
  }
  func.func @transform_3(%arg0: i32) -> (i32, i32) {
    %c0_i32 = arith.constant 0 : i32
    %c0_i32_0 = arith.constant 0 : i32
    return %arg0, %c0_i32 : i32, i32
  }
}

</mosaic_0001>

<bundles_post_ra>
// kernel: fasttext_forward.2
= control target key start
LH: loop header
LB: loop body
LE: loop exit
PB: predicated region body
PF: predicated region fallthrough
CT: control target
= control target key end

     0   :  { %vm30_vm0 = vcmask 1043456   ;;  %v116_v1 = vmov 0   ;;  %vm26_vm1 = vcmask 64512   ;;  %v117_v5 = vmov 1065369472   ;;  %s150_s0 = inlined_call_operand.vmem [shape: bf16[8,256], index: 0, kind: input, shape index: {}]   ;;  %s151_s1 = inlined_call_operand.vmem [shape: f32[1,256], index: 1, kind: output, shape index: {}]  }
   0x1   :  { %v20_v0 = vld [vmem:[%s150_s0] sm:$0xff]  ;;  %69 = vmatprep.mubr.bf16.mxu0 %v116_v1  ;;  %v14_v6 = vlaneseq  ;;  %v118_v8 = vmov 0.0   ;;  %v119_v9 = vmov 1966171168  }
   0x2   :  { %v107_v2 = vcombine.high %v20_v0, %v20_v0  ;;  %v106_v3 = vcombine.low %v20_v0, %v20_v0  ;;  %v82_v10 = vunpack.c.l.s4 %v119_v9 }
   0x3   :  { %vm133_vm2 = vcmp.lt.s32.totalorder %v14_v6, 256  ;;  %v85_v12 = vshrl.u32 %v14_v6, 7 }
   0x4   :  { %108 = vmatprep.subr.msk.bf16.mxu0 %vm30_vm0, %v107_v2  ;;  %v32_v4 = vsel %vm30_vm0, %v106_v3, 0  ;;  %18 = vst.msk [vmem:[%s151_s1] sm:$0x3] %vm133_vm2, %v118_v8  ;;  %v83_v11 = vunpack.c.0.s8 %v82_v10 }
   0x5   :  { %38 = vmatpush1.bf16.msra.mxu0 %v32_v4 }
   0x6   :  { %v86_v14 = vsub.s32 %v83_v11, %v85_v12 }
   0x8   :  { %109 = vmatmul.mubr.msk.bf16.vlgmr.msra.gmra.mrb[0].mxu0 %vm26_vm1, %v117_v5 }
   0xb   :  { %v19_v20 = vld [vmem:[%s151_s1] sm:$0x3] }
  0xdb   :  { %v71_v13 = vpop.f32.mrb[0].mxu0 }
  0xdc   :  { %v73_v15 = vpop.f32.mrb[1].mxu0 }
  0xdd   :  { %v80_v16 = vcombine.low %v71_v13, %v73_v15  ;;  %v75_v17 = vpop.f32.mrb[2].mxu0 }
  0xde   :  { %v76_v18 = vpop.f32.mrb[3].mxu0 }
  0xdf   :  { %v87_v19 = vrot.slane %v80_v16, %v86_v14 }
  0xe1   :  { %v94_v21 = vrot.slane %v87_v19, %v86_v14 }
  0xe3   :  { %v96_v22 = vadd.f32 %v94_v21, %v19_v20 }
  0xe5   :  { %101 = vst.msk [vmem:[%s151_s1] sm:$0x3] %vm133_vm2, %v96_v22 }

// kernel: fasttext_forward.3
= control target key start
LH: loop header
LB: loop body
LE: loop exit
PB: predicated region body
PF: predicated region fallthrough
CT: control target
= control target key end

     0   :  { %v132_v0 = vmov 0.0|0.0   ;;  %vm133_vm0 = vmmov 0   ;;  %v134_v4 = vmov 0.0   ;;  %vm26_vm1 = vcmask 261120   ;;  %s176_s1 = inlined_call_operand.vmem [shape: f32[32,128], index: 1, kind: input, shape index: {}]   ;;  %s177_s0 = inlined_call_operand.vmem [shape: f32[8,32], index: 0, kind: input, shape index: {}]   ;;  %s178_s2 = inlined_call_operand.vmem [shape: f32[1,128], index: 2, kind: input, shape index: {}]   ;;  %s179_s3 = inlined_call_operand.vmem [shape: f32[8,128], index: 3, kind: output, shape index: {}]  }
   0x1   :  { %123 = vmatprep.subr.bf16.mxu0 %v132_v0  ;;  %v15_v1 = vld [vmem:[%s176_s1] sm:$0xff]  ;;  %v16_v2 = vld [vmem:[%s176_s1 + $0x8] sm:$0xff]  ;;  %v17_v3 = vld [vmem:[%s176_s1 + $0x10] sm:$0xff]  ;;  %120 = vmatprep.mubr.msk.f32.mxu0 %vm133_vm0, %v134_v4 }
   0x2   :  { %v124_v5 = vpack.c.bf16 %v16_v2, %v15_v1  ;;  %v18_v6 = vld [vmem:[%s176_s1 + $0x18] sm:$0xff]  ;;  %v14_v8 = vld [vmem:[%s177_s0] sm:$0xff] }
   0x3   :  { %v127_v7 = vpack.c.bf16 %v18_v6, %v17_v3  ;;  %v105_v9 = vld [vmem:[%s178_s2] ss:$0 sm:$0xff] }
   0x4   :  { %125 = vmatpush3.bf16.msra.mxu0 %v124_v5 }
   0x5   :  { %126 = vmatprep.subr.bf16.mxu0 %v132_v0 }
   0x8   :  { %128 = vmatpush3.bf16.msra.mxu0 %v127_v7 }
   0xb   :  { %121 = vmatmul.mubr.msk.f32.vlgmr.msra.gmra.mrb[0].mxu0 %vm26_vm1, %v14_v8 }
  0xde   :  { %v96_v10 = vpop.f32.mrb[0].mxu0 }
  0xdf   :  { %v97_v11 = vadd.f32 %v105_v9, %v96_v10  ;;  %v122_v12 = vpop.f32.mrb[1].mxu0 }
  0xe1   :  { %100 = vst [vmem:[%s179_s3] sm:$0xff] %v97_v11 }

</bundles_post_ra>
